<compile_context>
chip_gen: v7x
topology: tpu7x:2x2x1
jax: 0.10.0
libtpu: 0.0.40
codegen_flags: <defaults>
</compile_context>

<pallas_src>
import functools

import jax
import jax.numpy as jnp
from jax.experimental import pallas as pl
from jax.experimental.pallas import tpu as pltpu


# --------------------------------------------------------------------------
# Kernel
# --------------------------------------------------------------------------
def _dino_loss_kernel(t_ref, s_ref, c_ref, out_ref, acc_ref, *,
                      inv_teacher_temp, inv_student_temp, inv_total_batch,
                      chunk_rows, num_chunks):
    i = pl.program_id(1)  # serial reduction over batch tiles within a split

    @pl.when(i == 0)
    def _init():
        acc_ref[...] = jnp.zeros_like(acc_ref)

    c = c_ref[...].astype(jnp.float32)                            # (1, D)

    def compute_chunk(t_raw, s_raw):
        # Teacher: unnormalized exp of centered / tempered logits, denom Z_t.
        t = (t_raw.astype(jnp.float32) - c) * inv_teacher_temp
        t = t - jnp.max(t, axis=1, keepdims=True)
        t_exp = jnp.exp(t)                                        # (cr, D)
        z_t = jnp.sum(t_exp, axis=1, keepdims=True)               # (cr, 1)

        # Student: log-sum-exp (no explicit softmax, no per-element log).
        s = s_raw.astype(jnp.float32) * inv_student_temp
        s_shift = s - jnp.max(s, axis=1, keepdims=True)           # (cr, D)
        z_s = jnp.sum(jnp.exp(s_shift), axis=1, keepdims=True)    # (cr, 1)
        log_z_s = jnp.log(z_s)                                    # (cr, 1)

        # Per-row cross entropy: logZ_s - (1/Z_t) * sum_d t_exp * s_shift.
        w = jnp.sum(t_exp * s_shift, axis=1, keepdims=True)       # (cr, 1)
        row_ce = log_z_s - w / z_t                                # (cr, 1)

        # Pure VALU vector accumulate; no per-step XLU reduce, no (1,1) RMW.
        acc_ref[...] += row_ce

    if num_chunks == 1:
        compute_chunk(t_ref[...], s_ref[...])
    else:
        # Bounds the live f32 temporaries to one chunk at a time.
        @pl.loop(0, num_chunks)
        def _chunks(ci):
            r0 = pl.multiple_of(ci * chunk_rows, 8)
            compute_chunk(t_ref[pl.ds(r0, chunk_rows), :],
                          s_ref[pl.ds(r0, chunk_rows), :])

    @pl.when(i == pl.num_programs(1) - 1)
    def _finalize():
        # Single cross-sublane reduce, then a lane-dense (8,128) store.
        total = jnp.sum(acc_ref[...], keepdims=True) * inv_total_batch  # (1,1)
        out_ref[...] = jnp.broadcast_to(total, out_ref.shape)


# --------------------------------------------------------------------------
# Hardware-aware defaults
# --------------------------------------------------------------------------
def _device_kind():
    try:
        return jax.devices()[0].device_kind.lower()
    except Exception:
        return ""


def _vmem_capacity_bytes():
    try:
        cap = int(getattr(pltpu.get_tpu_info(), "vmem_capacity_bytes", 0))
        if cap > 0:
            return cap
    except Exception:
        pass
    return (64 if "v7" in _device_kind() else 128) * 1024 * 1024


def _default_vmem_limit_bytes():
    cap = _vmem_capacity_bytes()
    limit = (cap * 3) // 4
    if "v7" in _device_kind():
        # 64 MiB per TensorCore on v7x; leave headroom.
        limit = min(limit, 48 * 1024 * 1024)
    return max(32 * 1024 * 1024, min(limit, 96 * 1024 * 1024))


def _is_megacore():
    # v7x has 2 TensorCores per chip; v5e/v6e have 1.
    return "v7" in _device_kind()


def _choose_tiling(batch, feat, itemsize, vmem_limit_bytes,
                   chunk_cap_rows=256):
    """Pick (tile_rows, chunk_rows).

    tile_rows sizes the double-buffered DMA block (2 inputs x 2 buffers);
    chunk_rows bounds the (rows, D) f32 temporaries the kernel materializes
    (~4 live arrays), so the budget accounts for intermediates, not just the
    pipeline buffers."""
    if batch % 8 != 0:
        # Block must equal the full dim when not sublane-aligned.
        return batch, batch

    temps_per_row = 4 * feat * 4  # ~4 live (rows, D) f32 temporaries
    chunk = min(chunk_cap_rows,
                max(8, ((vmem_limit_bytes // 4) // temps_per_row) // 8 * 8))

    # Remaining budget for the 2 inputs x 2 pipeline buffers (+ slack).
    bytes_per_row = 4 * feat * itemsize
    input_budget = vmem_limit_bytes - chunk * temps_per_row - 2 * 1024 * 1024
    input_budget = max(input_budget, 8 * bytes_per_row)
    max_rows = max(8, input_budget // bytes_per_row)

    tile = min(batch, (max_rows // 8) * 8)
    while tile > 8 and batch % tile != 0:
        tile -= 8
    tile = max(tile, 8)

    chunk = min(chunk, tile)
    while chunk > 8 and tile % chunk != 0:
        chunk -= 8
    chunk = max(chunk, 8)
    return tile, chunk


# --------------------------------------------------------------------------
# Wrapper
# --------------------------------------------------------------------------
def dino_loss(teacher_features, student_features, center_vector,
              teacher_temp=0.04, student_temp=0.1, *,
              tile_rows=None, chunk_rows=None, num_splits=None,
              vmem_limit_bytes=None):
    assert teacher_features.shape == student_features.shape
    B, D = teacher_features.shape
    center_2d = jnp.asarray(center_vector).reshape(1, D)

    itemsize = max(jnp.dtype(teacher_features.dtype).itemsize,
                   jnp.dtype(student_features.dtype).itemsize)

    if vmem_limit_bytes is None:
        vmem_limit_bytes = _default_vmem_limit_bytes()

    # TODO(synk): for very large D (tens of thousands) add a second
    # "arbitrary" grid axis over D-tiles with online max/sum stats.
    auto_tile, auto_chunk = _choose_tiling(B, D, itemsize, vmem_limit_bytes)
    if tile_rows is None:
        tile_rows = auto_tile
    assert tile_rows % 8 == 0 or tile_rows == B, (
        "tile_rows must be a multiple of 8 (sublanes) or equal the batch",
        tile_rows, B)
    assert B % tile_rows == 0, (B, tile_rows)

    if chunk_rows is None:
        chunk_rows = min(auto_chunk, tile_rows)
        while chunk_rows > 8 and tile_rows % chunk_rows != 0:
            chunk_rows -= 8
        if tile_rows % chunk_rows != 0:
            chunk_rows = tile_rows
    assert tile_rows % chunk_rows == 0, (tile_rows, chunk_rows)
    num_chunks = tile_rows // chunk_rows

    n_tiles = B // tile_rows
    if num_splits is None:
        cores = 2 if _is_megacore() else 1
        num_splits = cores if (n_tiles >= cores and n_tiles % cores == 0) else 1
    assert n_tiles % num_splits == 0, (n_tiles, num_splits)
    tiles_per_split = n_tiles // num_splits

    kernel = functools.partial(
        _dino_loss_kernel,
        inv_teacher_temp=1.0 / float(teacher_temp),
        inv_student_temp=1.0 / float(student_temp),
        inv_total_batch=1.0 / float(B),
        chunk_rows=chunk_rows, num_chunks=num_chunks)

    def row_block(p, i):
        return (p * tiles_per_split + i, 0)

    out = pl.pallas_call(
        kernel,
        out_shape=jax.ShapeDtypeStruct((num_splits * 8, 128), jnp.float32),
        grid_spec=pltpu.PrefetchScalarGridSpec(
            num_scalar_prefetch=0,
            grid=(num_splits, tiles_per_split),
            in_specs=[
                pl.BlockSpec((tile_rows, D), row_block),      # teacher tile
                pl.BlockSpec((tile_rows, D), row_block),      # student tile
                pl.BlockSpec((1, D), lambda p, i: (0, 0)),    # center (bcast)
            ],
            out_specs=pl.BlockSpec((8, 128), lambda p, i: (p, 0)),
            scratch_shapes=[pltpu.VMEM((chunk_rows, 1), jnp.float32)],
        ),
        compiler_params=pltpu.CompilerParams(
            # TODO(synk): if plain "parallel" does not shard across the two
            # v7x TensorCores, switch the split axis to pltpu.CORE_PARALLEL.
            dimension_semantics=("parallel", "arbitrary"),
            vmem_limit_bytes=int(vmem_limit_bytes),
        ),
    )(teacher_features, student_features, center_2d)

    # One (8,128) block per split; all elements of block p equal its partial.
    return jnp.sum(out[::8, 0])


# --------------------------------------------------------------------------
# Reference + tests
# --------------------------------------------------------------------------
def _reference_dino_loss(t, s, c, teacher_temp, student_temp):
    tp = jax.nn.softmax((t - c[None, :]) / teacher_temp, axis=1)
    sp = jax.nn.softmax(s / student_temp, axis=1)
    return -(tp * jnp.log(sp)).sum(axis=1).mean()


if __name__ == "__main__":
    teacher_temp, student_temp = 0.04, 0.1
    B, D = 64, 256

    key = jax.random.PRNGKey(0)
    k1, k2, k3 = jax.random.split(key, 3)
    teacher_features = jax.random.normal(k1, (B, D), dtype=jnp.float32)
    student_features = jax.random.normal(k2, (B, D), dtype=jnp.float32)
    center_vector = 0.1 * jax.random.normal(k3, (D,), dtype=jnp.float32)

    ref = _reference_dino_loss(teacher_features, student_features,
                               center_vector, teacher_temp, student_temp)

    # 1) Auto-tiled path (single large DMA tile at this size).
    loss = jax.block_until_ready(
        dino_loss(teacher_features, student_features, center_vector,
                  teacher_temp, student_temp))
    assert jnp.allclose(loss, ref, rtol=1e-3, atol=1e-3), (loss, ref)

    # 2) Forced multi-tile / multi-split accumulation path.
    loss_tiled = jax.block_until_ready(
        dino_loss(teacher_features, student_features, center_vector,
                  teacher_temp, student_temp, tile_rows=8, num_splits=2))
    assert jnp.allclose(loss_tiled, ref, rtol=1e-3, atol=1e-3), (loss_tiled, ref)

    # 3) Forced in-tile chunking path (4 compute chunks per DMA tile).
    loss_chunked = jax.block_until_ready(
        dino_loss(teacher_features, student_features, center_vector,
                  teacher_temp, student_temp, tile_rows=32, chunk_rows=8,
                  num_splits=1))
    assert jnp.allclose(loss_chunked, ref, rtol=1e-3, atol=1e-3), (loss_chunked, ref)

    # 4) bf16 input storage (HBM saver on v5e/v6e); in-kernel math stays f32.
    #    Validate against the bf16-quantized reference, not just isfinite.
    t_bf16 = teacher_features.astype(jnp.bfloat16)
    s_bf16 = student_features.astype(jnp.bfloat16)
    ref_bf16 = _reference_dino_loss(t_bf16.astype(jnp.float32),
                                    s_bf16.astype(jnp.float32),
                                    center_vector, teacher_temp, student_temp)
    loss_bf16 = jax.block_until_ready(
        dino_loss(t_bf16, s_bf16, center_vector, teacher_temp, student_temp))
    assert jnp.allclose(loss_bf16, ref_bf16, rtol=2e-2, atol=2e-2), (
        loss_bf16, ref_bf16)

    print("KERNEL_OK")
</pallas_src>

<mosaic_0001>
module attributes {stable_mosaic.version = 11 : i64} {
  func.func @_dino_loss_kernel(%arg0: i32, %arg1: i32, %arg2: memref<64x256xf32, #tpu.memory_space<vmem>>, %arg3: memref<64x256xf32, #tpu.memory_space<vmem>>, %arg4: memref<1x256xf32, #tpu.memory_space<vmem>>, %arg5: memref<8x128xf32, #tpu.memory_space<vmem>>, %arg6: memref<64x1xf32, #tpu.memory_space<vmem>>) attributes {dimension_semantics = [#tpu.dimension_semantics<parallel>, #tpu.dimension_semantics<arbitrary>], iteration_bounds = array<i64: 1, 1>, scalar_prefetch = 0 : i64, scratch_operands = 1 : i64, tpu.core_type = #tpu.core_type<tc>, window_params = [{transform_indices = @transform_0, window_bounds = array<i64: 64, 256>}, {transform_indices = @transform_1, window_bounds = array<i64: 64, 256>}, {pipeline_mode = #tpu.pipeline_mode<synchronous>, transform_indices = @transform_2, window_bounds = array<i64: 1, 256>}, {transform_indices = @transform_3, window_bounds = array<i64: 8, 128>}]} {
    %c0_i32 = arith.constant 0 : i32
    %0 = arith.cmpi eq, %arg1, %c0_i32 : i32
    %1 = arith.extui %0 : i1 to i32
    %c0_i32_0 = arith.constant 0 : i32
    %2 = arith.cmpi ne, %1, %c0_i32_0 : i32
    scf.if %2 {
      %cst_18 = arith.constant 0.000000e+00 : f32
      %38 = vector.broadcast %cst_18 : f32 to vector<64x1xf32>
      %c0_19 = arith.constant 0 : index
      %c0_20 = arith.constant 0 : index
      %39 = vector.load %arg6[%c0_19, %c0_20] : memref<64x1xf32, #tpu.memory_space<vmem>>, vector<64x1xf32>
      tpu.vector_store %arg6[%c0_19, %c0_20], %38 {strides = array<i32>} : memref<64x1xf32, #tpu.memory_space<vmem>>, vector<64x1xf32>,
    } else {
    }
    %c0 = arith.constant 0 : index
    %c0_1 = arith.constant 0 : index
    %3 = vector.load %arg4[%c0, %c0_1] : memref<1x256xf32, #tpu.memory_space<vmem>>, vector<1x256xf32>
    %c0_2 = arith.constant 0 : index
    %c0_3 = arith.constant 0 : index
    %4 = vector.load %arg2[%c0_2, %c0_3] : memref<64x256xf32, #tpu.memory_space<vmem>>, vector<64x256xf32>
    %c0_4 = arith.constant 0 : index
    %c0_5 = arith.constant 0 : index
    %5 = vector.load %arg3[%c0_4, %c0_5] : memref<64x256xf32, #tpu.memory_space<vmem>>, vector<64x256xf32>
    %6 = vector.broadcast %3 : vector<1x256xf32> to vector<64x256xf32>
    %7 = arith.subf %4, %6 : vector<64x256xf32>
    %cst = arith.constant 2.500000e+01 : f32
    %8 = vector.broadcast %cst : f32 to vector<64x256xf32>
    %9 = arith.mulf %7, %8 : vector<64x256xf32>
    %cst_6 = arith.constant dense<0xFF800000> : vector<64xf32>
    %10 = vector.multi_reduction <maximumf>, %9, %cst_6 [1] : vector<64x256xf32> to vector<64xf32>
    %11 = vector.shape_cast %10 : vector<64xf32> to vector<64x1xf32>
    %12 = vector.broadcast %11 : vector<64x1xf32> to vector<64x256xf32>
    %13 = arith.subf %9, %12 : vector<64x256xf32>
    %14 = math.exp %13 : vector<64x256xf32>
    %cst_7 = arith.constant dense<0.000000e+00> : vector<64xf32>
    %15 = vector.multi_reduction <add>, %14, %cst_7 [1] : vector<64x256xf32> to vector<64xf32>
    %16 = vector.shape_cast %15 : vector<64xf32> to vector<64x1xf32>
    %cst_8 = arith.constant 1.000000e+01 : f32
    %17 = vector.broadcast %cst_8 : f32 to vector<64x256xf32>
    %18 = arith.mulf %5, %17 : vector<64x256xf32>
    %cst_9 = arith.constant dense<0xFF800000> : vector<64xf32>
    %19 = vector.multi_reduction <maximumf>, %18, %cst_9 [1] : vector<64x256xf32> to vector<64xf32>
    %20 = vector.shape_cast %19 : vector<64xf32> to vector<64x1xf32>
    %21 = vector.broadcast %20 : vector<64x1xf32> to vector<64x256xf32>
    %22 = arith.subf %18, %21 : vector<64x256xf32>
    %23 = math.exp %22 : vector<64x256xf32>
    %cst_10 = arith.constant dense<0.000000e+00> : vector<64xf32>
    %24 = vector.multi_reduction <add>, %23, %cst_10 [1] : vector<64x256xf32> to vector<64xf32>
    %25 = vector.shape_cast %24 : vector<64xf32> to vector<64x1xf32>
    %26 = math.log %25 : vector<64x1xf32>
    %27 = arith.mulf %14, %22 : vector<64x256xf32>
    %cst_11 = arith.constant dense<0.000000e+00> : vector<64xf32>
    %28 = vector.multi_reduction <add>, %27, %cst_11 [1] : vector<64x256xf32> to vector<64xf32>
    %29 = vector.shape_cast %28 : vector<64xf32> to vector<64x1xf32>
    %30 = arith.divf %29, %16 : vector<64x1xf32>
    %31 = arith.subf %26, %30 : vector<64x1xf32>
    %c0_12 = arith.constant 0 : index
    %c0_13 = arith.constant 0 : index
    %32 = vector.load %arg6[%c0_12, %c0_13] : memref<64x1xf32, #tpu.memory_space<vmem>>, vector<64x1xf32>
    %33 = arith.addf %32, %31 : vector<64x1xf32>
    %c0_14 = arith.constant 0 : index
    %c0_15 = arith.constant 0 : index
    %34 = vector.load %arg6[%c0_14, %c0_15] : memref<64x1xf32, #tpu.memory_space<vmem>>, vector<64x1xf32>
    tpu.vector_store %arg6[%c0_14, %c0_15], %33 {strides = array<i32>} : memref<64x1xf32, #tpu.memory_space<vmem>>, vector<64x1xf32>,
    %c0_i32_16 = arith.constant 0 : i32
    %35 = arith.cmpi eq, %arg1, %c0_i32_16 : i32
    %36 = arith.extui %35 : i1 to i32
    %c0_i32_17 = arith.constant 0 : i32
    %37 = arith.cmpi ne, %36, %c0_i32_17 : i32
    scf.if %37 {
      %c0_18 = arith.constant 0 : index
      %c0_19 = arith.constant 0 : index
      %38 = vector.load %arg6[%c0_18, %c0_19] : memref<64x1xf32, #tpu.memory_space<vmem>>, vector<64x1xf32>
      %39 = vector.shape_cast %38 : vector<64x1xf32> to vector<1x64x1xf32>
      %cst_20 = arith.constant dense<0.000000e+00> : vector<1xf32>
      %40 = vector.multi_reduction <add>, %39, %cst_20 [1, 2] : vector<1x64x1xf32> to vector<1xf32>
      %41 = vector.shape_cast %40 : vector<1xf32> to vector<1x1x1xf32>
      %42 = vector.extract %41[0, 0, 0] : f32 from vector<1x1x1xf32>
      %43 = vector.broadcast %42 : f32 to vector<1x1xf32>
      %cst_21 = arith.constant 1.562500e-02 : f32
      %44 = vector.broadcast %cst_21 : f32 to vector<1x1xf32>
      %45 = arith.mulf %43, %44 : vector<1x1xf32>
      %46 = vector.shape_cast %45 : vector<1x1xf32> to vector<1x1xf32>
      %47 = vector.broadcast %46 : vector<1x1xf32> to vector<8x128xf32>
      %c0_22 = arith.constant 0 : index
      %c0_23 = arith.constant 0 : index
      %48 = vector.load %arg5[%c0_22, %c0_23] : memref<8x128xf32, #tpu.memory_space<vmem>>, vector<8x128xf32>
      tpu.vector_store %arg5[%c0_22, %c0_23], %47 {strides = array<i32>} : memref<8x128xf32, #tpu.memory_space<vmem>>, vector<8x128xf32>,
    } else {
    }
    return
  }
  func.func @transform_0(%arg0: i32, %arg1: i32) -> (i32, i32) {
    %c1_i32 = arith.constant 1 : i32
    %0 = arith.muli %arg0, %c1_i32 : i32
    %1 = arith.addi %0, %arg1 : i32
    %c0_i32 = arith.constant 0 : i32
    %c0_i32_0 = arith.constant 0 : i32
    return %1, %c0_i32 : i32, i32
  }
  func.func @transform_1(%arg0: i32, %arg1: i32) -> (i32, i32) {
    %c1_i32 = arith.constant 1 : i32
    %0 = arith.muli %arg0, %c1_i32 : i32
    %1 = arith.addi %0, %arg1 : i32
    %c0_i32 = arith.constant 0 : i32
    %c0_i32_0 = arith.constant 0 : i32
    return %1, %c0_i32 : i32, i32
  }
  func.func @transform_2(%arg0: i32, %arg1: i32) -> (i32, i32) {
    %c0_i32 = arith.constant 0 : i32
    %c0_i32_0 = arith.constant 0 : i32
    %c0_i32_1 = arith.constant 0 : i32
    return %c0_i32, %c0_i32_0 : i32, i32
  }
  func.func @transform_3(%arg0: i32, %arg1: i32) -> (i32, i32) {
    %c0_i32 = arith.constant 0 : i32
    %c0_i32_0 = arith.constant 0 : i32
    return %arg0, %c0_i32 : i32, i32
  }
}

</mosaic_0001>

<bundles_post_ra>
// kernel: tpu_custom_call.1
= control target key start
LH: loop header
LB: loop body
LE: loop exit
PB: predicated region body
PF: predicated region fallthrough
CT: control target
= control target key end

     0   :  { %8 = vsyncpa [#allocation4], 0  ;;  %s1065_s0 = inlined_call_operand.hbm [shape: f32[64,256], index: 0, kind: input, shape index: {}]   ;;  %s1066_s1 = inlined_call_operand.hbm [shape: f32[64,256], index: 1, kind: input, shape index: {}]   ;;  %s1067_s2 = inlined_call_operand.hbm [shape: f32[1,256], index: 2, kind: input, shape index: {}]   ;;  %s1068_s3 = inlined_call_operand.hbm [shape: f32[8,128], index: 3, kind: output, shape index: {}]  }
   0x1   :  { %9 = vsyncpa [#allocation7], 0 }
   0x2   :  { %10 = vsyncpa [#allocation5], 0  ;;  %s723_s12 = smov [#allocation6]   ;;  %s724_s14 = smov [#allocation3]  }
   0x3   :  { %s38_s13 = sshll.u32 %s723_s12, 4  ;;  %s21_s15 = sshll.u32 %s724_s14, 4  ;;  %s39_s13 = int_to_ptr.vmem [resolvable:$true] %s38_s13  ;;  %s750_s15 = int_to_ptr.vmem [resolvable:$true] %s21_s15 }
   0x4   :  { %s629_s18 = scalar_lea.hbm %s1066_s1, 2048 }
   0x5   :  { %p630_p0 = scmp.ne.s32.totalorder %s1066_s1, %s629_s18  ;;  %p633_p1 = scmp.lt.u32.totalorder %s629_s18, %s1066_s1 }
   0x7   :  { %p635_p2 = pnand %p633_p1, %p630_p0 }
   0x9   :  { %638 = shalt.err (!%p635_p2)
}
   0xa   :  { %s639_s23 = scalar_lea.vmem %s39_s13, 2048  ;;  %p644_p4 = scmp.lt.s32.totalorder %s39_s13, %s39_s13 }
   0xb   :  { %p640_p3 = scmp.ne.s32.totalorder %s39_s13, %s639_s23  ;;  %p645_p5 = scmp.lt.s32.totalorder %s639_s23, %s639_s23 }
   0xd   :  { %p646_p6 = por %p645_p5, %p644_p4 }
   0xf   :  { %p647_p7 = pnand %p646_p6, %p640_p3 }
  0x11   :  { %650 = shalt.err (!%p647_p7)
}
  0x12   :  { %s725_s24 = smov 256   ;;  %s726_s25 = smov 16  }
  0x13   :  { %44 = dma.hbm_to_vmem [thread:$0]  %s1066_s1, 2048, %s39_s13, [#allocation7], %s725_s24, %s725_s24, %s726_s25  }
  0x14   :  { %s651_s30 = scalar_lea.hbm %s1065_s0, 2048 }
  0x15   :  { %p652_p8 = scmp.ne.s32.totalorder %s1065_s0, %s651_s30  ;;  %p655_p9 = scmp.lt.u32.totalorder %s651_s30, %s1065_s0 }
  0x17   :  { %p657_p10 = pnand %p655_p9, %p652_p8 }
  0x19   :  { %660 = shalt.err (!%p657_p10)
}
  0x1a   :  { %s661_s8 = scalar_lea.vmem %s750_s15, 2048  ;;  %p666_p12 = scmp.lt.s32.totalorder %s750_s15, %s750_s15 }
  0x1b   :  { %p662_p11 = scmp.ne.s32.totalorder %s750_s15, %s661_s8  ;;  %p667_p13 = scmp.lt.s32.totalorder %s661_s8, %s661_s8 }
  0x1d   :  { %p668_p0 = por %p667_p13, %p666_p12 }
  0x1f   :  { %p669_p1 = pnand %p668_p0, %p662_p11 }
  0x21   :  { %672 = shalt.err (!%p669_p1)
}
  0x22   :  { %27 = dma.hbm_to_vmem [thread:$0]  %s1065_s0, 2048, %s750_s15, [#allocation4], %s725_s24, %s725_s24, %s726_s25  }
  0x23   :  { %s727_s10 = smov [#allocation8]   ;;  %s673_s14 = scalar_lea.hbm %s1067_s2, 32 }
  0x24   :  { %s51_s11 = sshll.u32 %s727_s10, 4  ;;  %p674_p2 = scmp.ne.s32.totalorder %s1067_s2, %s673_s14  ;;  %s52_s11 = int_to_ptr.vmem [resolvable:$true] %s51_s11 }
  0x25   :  { %p677_p3 = scmp.lt.u32.totalorder %s673_s14, %s1067_s2 }
  0x27   :  { %p679_p4 = pnand %p677_p3, %p674_p2 }
  0x29   :  { %682 = shalt.err (!%p679_p4)
}
  0x2a   :  { %s683_s20 = scalar_lea.vmem %s52_s11, 32  ;;  %p688_p6 = scmp.lt.s32.totalorder %s52_s11, %s52_s11 }
  0x2b   :  { %p684_p5 = scmp.ne.s32.totalorder %s52_s11, %s683_s20  ;;  %p689_p7 = scmp.lt.s32.totalorder %s683_s20, %s683_s20 }
  0x2d   :  { %p690_p8 = por %p689_p7, %p688_p6 }
  0x2f   :  { %p691_p9 = pnand %p690_p8, %p684_p5 }
  0x31   :  { %694 = shalt.err (!%p691_p9)
}
  0x32   :  { %54 = dma.hbm_to_vmem [thread:$0]  %s1067_s2, 32, %s52_s11, [#allocation7]  }
  0x33   :  { %717 = dma.done.wait [#allocation4], 2048  }
  0x34   :  { %718 = vsyncadd [#allocation4], 4294965248 }
  0x35   :  { %719 = dma.done.wait [#allocation7], 2080  }
  0x36   :  { %720 = vsyncadd [#allocation7], 4294965216  ;;  %v115_v0 = vlaneseq  ;;  %v98_v4 = vld [vmem:[#allocation6] sm:$0xff]  ;;  %v99_v5 = vld [vmem:[#allocation6 + $0x8] sm:$0xff]  ;;  %vm72_vm0 = vcmask 7168   ;;  %s729_s2 = smov [#allocation9]  }
  0x37   :  { %v100_v6 = vld [vmem:[#allocation6 + $0x10] sm:$0xff]  ;;  %v793_v7 = vmul.f32 10.0, %v98_v4  ;;  %v795_v8 = vmul.f32 10.0, %v99_v5  ;;  %v101_v9 = vld [vmem:[#allocation6 + $0x18] sm:$0xff]  ;;  %v81_v11 = vld [vmem:[#allocation8] sm:$0x3] }
  0x38   :  { %v116_v1 = vshrl.u32 %v115_v0, 7  ;;  %v797_v10 = vmul.f32 10.0, %v100_v6  ;;  %v799_v12 = vmul.f32 10.0, %v101_v9  ;;  %v82_v13 = vld [vmem:[#allocation3] sm:$0xff]  ;;  %v83_v14 = vld [vmem:[#allocation3 + $0x8] sm:$0xff]  ;;  %v84_v20 = vld [vmem:[#allocation3 + $0x10] sm:$0xff] }
  0x39   :  { %v102_v17 = vld [vmem:[#allocation6 + $0x20] sm:$0xff]  ;;  %v269_v18 = vmax.f32 %v793_v7, %v795_v8  ;;  %v103_v19 = vld [vmem:[#allocation6 + $0x28] sm:$0xff]  ;;  %v85_v21 = vld [vmem:[#allocation3 + $0x18] sm:$0xff]  ;;  %s514_s21 = sshll.u32 %s729_s2, 4  ;;  %s515_s21 = int_to_ptr.vmem [resolvable:$true] %s514_s21 }
  0x3a   :  { %v117_v2 = vsub.s32 0, %v116_v1  ;;  %v121_v3 = vsub.s32 1, %v116_v1  ;;  %v809_v24 = vmul.f32 10.0, %v102_v17  ;;  %v86_v25 = vld [vmem:[#allocation3 + $0x20] sm:$0xff]  ;;  %v272_v26 = vmax.f32 %v797_v10, %v799_v12  ;;  %v87_v30 = vld [vmem:[#allocation3 + $0x28] sm:$0xff]  ;;  %v104_v33 = vld [vmem:[#allocation6 + $0x30] sm:$0xff]  ;;  %p700_p11 = scmp.lt.s32.totalorder %s515_s21, %s515_s21 }
  0x3b   :  { %270 = vmax.xlane.f32.xlu1 %v269_v18  ;;  %v813_v27 = vmul.f32 10.0, %v103_v19  ;;  %v105_v34 = vld [vmem:[#allocation6 + $0x38] sm:$0xff]  ;;  %v88_v39 = vld [vmem:[#allocation3 + $0x30] sm:$0xff]  ;;  %v831_v43 = vmul.f32 10.0, %v104_v33  ;;  %v106_v48 = vld [vmem:[#allocation6 + $0x40] sm:$0xff]  ;;  %s695_s23 = scalar_lea.vmem %s515_s21, 128 }
  0x3c   :  { %v801_v15 = vrot.slane %v81_v11, %v117_v2  ;;  %v803_v16 = vrot.slane %v81_v11, %v121_v3  ;;  %v89_v40 = vld [vmem:[#allocation3 + $0x38] sm:$0xff]  ;;  %v833_v44 = vmul.f32 10.0, %v105_v34  ;;  %v107_v49 = vld [vmem:[#allocation6 + $0x48] sm:$0xff]  ;;  %v90_v52 = vld [vmem:[#allocation3 + $0x40] sm:$0xff]  ;;  %v845_v55 = vmul.f32 10.0, %v106_v48  ;;  %p696_p10 = scmp.ne.s32.totalorder %s515_s21, %s695_s23  ;;  %p701_p12 = scmp.lt.s32.totalorder %s695_s23, %s695_s23 }
  0x3d   :  { %v275_v42 = vmax.f32 %v809_v24, %v813_v27  ;;  %v91_v53 = vld [vmem:[#allocation3 + $0x48] sm:$0xff]  ;;  %v847_v56 = vmul.f32 10.0, %v107_v49  ;;  %v108_v57 = vld [vmem:[#allocation6 + $0x50] sm:$0xff]  ;;  %v109_v58 = vld [vmem:[#allocation6 + $0x58] sm:$0xff] }
  0x3e   :  { %v125_v22 = vsub.f32 %v82_v13, %v801_v15  ;;  %v126_v23 = vsub.f32 %v83_v14, %v803_v16  ;;  %v127_v28 = vsub.f32 %v84_v20, %v801_v15  ;;  %v128_v29 = vsub.f32 %v85_v21, %v803_v16  ;;  %v92_v0 = vld [vmem:[#allocation3 + $0x50] sm:$0xff]  ;;  %v93_v1 = vld [vmem:[#allocation3 + $0x58] sm:$0xff]  ;;  %v110_v14 = vld [vmem:[#allocation6 + $0x60] sm:$0xff]  ;;  %p702_p13 = por %p701_p12, %p700_p11 }
  0x3f   :  { %v129_v35 = vsub.f32 %v86_v25, %v801_v15  ;;  %v130_v38 = vsub.f32 %v87_v30, %v803_v16  ;;  %273 = vmax.xlane.f32.xlu1 %v272_v26  ;;  %v131_v50 = vsub.f32 %v88_v39, %v801_v15  ;;  %v132_v51 = vsub.f32 %v89_v40, %v803_v16  ;;  %v111_v17 = vld [vmem:[#allocation6 + $0x68] sm:$0xff]  ;;  %v94_v18 = vld [vmem:[#allocation3 + $0x60] sm:$0xff]  ;;  %v112_v30 = vld [vmem:[#allocation6 + $0x70] sm:$0xff] }
  0x40   :  { %v817_v31 = vmul.f32 25.0, %v125_v22  ;;  %v819_v32 = vmul.f32 25.0, %v126_v23  ;;  %v822_v36 = vmul.f32 25.0, %v127_v28  ;;  %v824_v37 = vmul.f32 25.0, %v128_v29  ;;  %v95_v19 = vld [vmem:[#allocation3 + $0x68] sm:$0xff]  ;;  %v113_v33 = vld [vmem:[#allocation6 + $0x78] sm:$0xff]  ;;  %p703_p0 = pnand %p702_p13, %p696_p10 }
  0x41   :  { %v835_v45 = vmul.f32 25.0, %v129_v35  ;;  %v839_v47 = vmul.f32 25.0, %v130_v38  ;;  %v278_v54 = vmax.f32 %v831_v43, %v833_v44  ;;  %v133_v59 = vsub.f32 %v90_v52, %v801_v15  ;;  %v96_v34 = vld [vmem:[#allocation3 + $0x70] sm:$0xff]  ;;  %v97_v35 = vld [vmem:[#allocation3 + $0x78] sm:$0xff] }
  0x42   :  { %v157_v41 = vmax.f32 %v817_v31, %v819_v32  ;;  %v160_v46 = vmax.f32 %v822_v36, %v824_v37  ;;  %v852_v61 = vmul.f32 25.0, %v131_v50  ;;  %v854_v62 = vmul.f32 25.0, %v132_v51 }
  0x43   :  { %276 = vmax.xlane.f32.xlu1 %v275_v42  ;;  %v163_v60 = vmax.f32 %v835_v45, %v839_v47  ;;  %v134_v63 = vsub.f32 %v91_v53, %v803_v16  ;;  %v857_v2 = vmul.f32 10.0, %v108_v57  ;;  %v859_v3 = vmul.f32 10.0, %v109_v58 }
  0x44   :  { %158 = vmax.xlane.f32.xlu0 %v157_v41  ;;  %v281_v4 = vmax.f32 %v845_v55, %v847_v56  ;;  %v135_v5 = vsub.f32 %v92_v0, %v801_v15  ;;  %v136_v6 = vsub.f32 %v93_v1, %v803_v16  ;;  %v166_v9 = vmax.f32 %v852_v61, %v854_v62 }
  0x45   :  { %v867_v11 = vmul.f32 25.0, %v133_v59  ;;  %v869_v13 = vmul.f32 25.0, %v134_v63  ;;  %v284_v20 = vmax.f32 %v857_v2, %v859_v3  ;;  %v877_v23 = vmul.f32 10.0, %v110_v14 }
  0x46   :  { %v873_v21 = vmul.f32 25.0, %v135_v5  ;;  %v875_v22 = vmul.f32 25.0, %v136_v6  ;;  %v879_v25 = vmul.f32 10.0, %v111_v17  ;;  %v137_v28 = vsub.f32 %v94_v18, %v801_v15 }
  0x47   :  { %279 = vmax.xlane.f32.xlu1 %v278_v54  ;;  %v169_v26 = vmax.f32 %v867_v11, %v869_v13  ;;  %v138_v29 = vsub.f32 %v95_v19, %v803_v16  ;;  %v889_v40 = vmul.f32 10.0, %v112_v30  ;;  %v891_v41 = vmul.f32 10.0, %v113_v33 }
  0x48   :  { %161 = vmax.xlane.f32.xlu0 %v160_v46  ;;  %v172_v38 = vmax.f32 %v873_v21, %v875_v22  ;;  %v287_v39 = vmax.f32 %v877_v23, %v879_v25  ;;  %v893_v42 = vmul.f32 25.0, %v137_v28  ;;  %v139_v48 = vsub.f32 %v96_v34, %v801_v15 }
  0x49   :  { %v895_v46 = vmul.f32 25.0, %v138_v29  ;;  %v140_v49 = vsub.f32 %v97_v35, %v803_v16  ;;  %v290_v50 = vmax.f32 %v889_v40, %v891_v41 }
  0x4a   :  { %v903_v52 = vmul.f32 25.0, %v139_v48 }
  0x4b   :  { %282 = vmax.xlane.f32.xlu1 %v281_v4  ;;  %v175_v51 = vmax.f32 %v893_v42, %v895_v46  ;;  %v905_v53 = vmul.f32 25.0, %v140_v49 }
  0x4c   :  { %164 = vmax.xlane.f32.xlu0 %v163_v60 }
  0x4d   :  { %v178_v54 = vmax.f32 %v903_v52, %v905_v53 }
  0x4f   :  { %285 = vmax.xlane.f32.xlu1 %v284_v20 }
  0x50   :  { %167 = vmax.xlane.f32.xlu0 %v166_v9 }
  0x53   :  { %288 = vmax.xlane.f32.xlu1 %v287_v39 }
  0x54   :  { %170 = vmax.xlane.f32.xlu0 %v169_v26 }
  0x57   :  { %291 = vmax.xlane.f32.xlu1 %v290_v50 }
  0x58   :  { %173 = vmax.xlane.f32.xlu0 %v172_v38 }
  0x5c   :  { %176 = vmax.xlane.f32.xlu0 %v175_v51 }
  0x60   :  { %179 = vmax.xlane.f32.xlu0 %v178_v54 }
  0xc8   :  { %v271_v15 = vpop.xlane.xlu1 %270 }
  0xc9   :  { %v910_v16 = vsub.f32 %v793_v7, %v271_v15  ;;  %v913_v57 = vsub.f32 %v795_v8, %v271_v15 }
  0xcb   :  { %v309_v58 = vmul.f32 1.442695, %v910_v16  ;;  %v311_v59 = vmul.f32 1.442695, %v913_v57 }
  0xcc   :  { %v274_v60 = vpop.xlane.xlu1 %273 }
  0xcd   :  { %533 = vpow2.f32 %v309_v58  ;;  %v918_v63 = vsub.f32 %v797_v10, %v274_v60  ;;  %v921_v0 = vsub.f32 %v799_v12, %v274_v60 }
  0xce   :  { %535 = vpow2.f32 %v311_v59 }
  0xcf   :  { %v313_v8 = vmul.f32 1.442695, %v918_v63  ;;  %v315_v5 = vmul.f32 1.442695, %v921_v0 }
  0xd0   :  { %v277_v14 = vpop.xlane.xlu1 %276 }
  0xd1   :  { %v159_v1 = vpop.xlane.xlu0 %158  ;;  %537 = vpow2.f32 %v313_v8  ;;  %v928_v10 = vsub.f32 %v809_v24, %v277_v14  ;;  %v931_v12 = vsub.f32 %v813_v27, %v277_v14 }
  0xd2   :  { %v181_v7 = vsub.f32 %v817_v31, %v159_v1  ;;  %v182_v4 = vsub.f32 %v819_v32, %v159_v1  ;;  %539 = vpow2.f32 %v315_v5 }
  0xd3   :  { %v317_v18 = vmul.f32 1.442695, %v928_v10  ;;  %v319_v19 = vmul.f32 1.442695, %v931_v12 }
  0xd4   :  { %v197_v6 = vmul.f32 1.442695, %v181_v7  ;;  %v199_v9 = vmul.f32 1.442695, %v182_v4  ;;  %v280_v28 = vpop.xlane.xlu1 %279 }
  0xd5   :  { %v162_v17 = vpop.xlane.xlu0 %161  ;;  %v938_v24 = vsub.f32 %v831_v43, %v280_v28  ;;  %v941_v27 = vsub.f32 %v833_v44, %v280_v28 }
  0xd6   :  { %v183_v31 = vsub.f32 %v822_v36, %v162_v17  ;;  %v184_v32 = vsub.f32 %v824_v37, %v162_v17  ;;  %541 = vpow2.f32 %v197_v6 }
  0xd7   :  { %543 = vpow2.f32 %v199_v9  ;;  %v534_v30 = vpop.eup %533  ;;  %v321_v33 = vmul.f32 1.442695, %v938_v24  ;;  %v323_v34 = vmul.f32 1.442695, %v941_v27 }
  0xd8   :  { %v201_v20 = vmul.f32 1.442695, %v183_v31  ;;  %v203_v26 = vmul.f32 1.442695, %v184_v32  ;;  %545 = vpow2.f32 %v317_v18  ;;  %v536_v35 = vpop.eup %535  ;;  %v283_v39 = vpop.xlane.xlu1 %282 }
  0xd9   :  { %v165_v29 = vpop.xlane.xlu0 %164  ;;  %547 = vpow2.f32 %v319_v19  ;;  %v948_v44 = vsub.f32 %v845_v55, %v283_v39  ;;  %v951_v48 = vsub.f32 %v847_v56, %v283_v39 }
  0xda   :  { %v185_v36 = vsub.f32 %v835_v45, %v165_v29  ;;  %v186_v37 = vsub.f32 %v839_v47, %v165_v29  ;;  %549 = vpow2.f32 %v201_v20  ;;  %v341_v47 = vadd.f32 %v536_v35, %v534_v30 }
  0xdb   :  { %551 = vpow2.f32 %v203_v26  ;;  %v538_v51 = vpop.eup %537  ;;  %v325_v54 = vmul.f32 1.442695, %v948_v44  ;;  %v327_v15 = vmul.f32 1.442695, %v951_v48 }
  0xdc   :  { %v205_v38 = vmul.f32 1.442695, %v185_v36  ;;  %v207_v43 = vmul.f32 1.442695, %v186_v37  ;;  %553 = vpow2.f32 %v321_v33  ;;  %342 = vadd.xlane.f32.xlu0 %v341_v47  ;;  %v540_v58 = vpop.eup %539  ;;  %v286_v56 = vpop.xlane.xlu1 %285 }
  0xdd   :  { %v168_v45 = vpop.xlane.xlu0 %167  ;;  %555 = vpow2.f32 %v323_v34  ;;  %v960_v1 = vsub.f32 %v857_v2, %v286_v56  ;;  %v344_v7 = vadd.f32 %v540_v58, %v538_v51 }
  0xde   :  { %v187_v49 = vsub.f32 %v852_v61, %v168_v45  ;;  %v188_v50 = vsub.f32 %v854_v62, %v168_v45  ;;  %557 = vpow2.f32 %v205_v38  ;;  %v963_v61 = vsub.f32 %v859_v3, %v286_v56 }
  0xdf   :  { %559 = vpow2.f32 %v207_v43  ;;  %v329_v9 = vmul.f32 1.442695, %v960_v1  ;;  %345 = vadd.xlane.f32.xlu1 %v344_v7 }
  0xe0   :  { %v209_v55 = vmul.f32 1.442695, %v187_v49  ;;  %v211_v59 = vmul.f32 1.442695, %v188_v50  ;;  %v957_v60 = vpop.eup %541  ;;  %561 = vpow2.f32 %v325_v54  ;;  %v331_v14 = vmul.f32 1.442695, %v963_v61  ;;  %v289_v32 = vpop.xlane.xlu1 %288 }
  0xe1   :  { %v171_v62 = vpop.xlane.xlu0 %170  ;;  %v965_v4 = vpop.eup %543  ;;  %563 = vpow2.f32 %v327_v15  ;;  %v976_v19 = vsub.f32 %v877_v23, %v289_v32  ;;  %v979_v20 = vsub.f32 %v879_v25, %v289_v32 }
  0xe2   :  { %v189_v8 = vsub.f32 %v867_v11, %v171_v62  ;;  %v190_v5 = vsub.f32 %v869_v13, %v171_v62  ;;  %v546_v6 = vpop.eup %545  ;;  %565 = vpow2.f32 %v209_v55  ;;  %v229_v2 = vadd.f32 %v965_v4, %v957_v60 }
  0xe3   :  { %v548_v3 = vpop.eup %547  ;;  %567 = vpow2.f32 %v211_v59  ;;  %v333_v37 = vmul.f32 1.442695, %v976_v19  ;;  %v335_v34 = vmul.f32 1.442695, %v979_v20 }
  0xe4   :  { %v213_v17 = vmul.f32 1.442695, %v189_v8  ;;  %v215_v31 = vmul.f32 1.442695, %v190_v5  ;;  %v973_v18 = vpop.eup %549  ;;  %569 = vpow2.f32 %v329_v9  ;;  %230 = vadd.xlane.f32.xlu0 %v229_v2  ;;  %v347_v13 = vadd.f32 %v548_v3, %v546_v6  ;;  %v292_v25 = vpop.xlane.xlu1 %291 }
  0xe5   :  { %v174_v11 = vpop.xlane.xlu0 %173  ;;  %v981_v26 = vpop.eup %551  ;;  %571 = vpow2.f32 %v331_v14 }
  0xe6   :  { %v191_v28 = vsub.f32 %v873_v21, %v174_v11  ;;  %v192_v29 = vsub.f32 %v875_v22, %v174_v11  ;;  %v554_v36 = vpop.eup %553  ;;  %573 = vpow2.f32 %v213_v17  ;;  %348 = vadd.xlane.f32.xlu1 %v347_v13  ;;  %v990_v21 = vsub.f32 %v889_v40, %v292_v25 }
  0xe7   :  { %v556_v30 = vpop.eup %555  ;;  %575 = vpow2.f32 %v215_v31  ;;  %v993_v22 = vsub.f32 %v891_v41, %v292_v25  ;;  %v383_v25 = vmul.f32 %v973_v18, %v918_v63 }
  0xe8   :  { %v217_v33 = vmul.f32 1.442695, %v191_v28  ;;  %v219_v23 = vmul.f32 1.442695, %v192_v29  ;;  %v987_v35 = vpop.eup %557  ;;  %577 = vpow2.f32 %v333_v37  ;;  %v350_v43 = vadd.f32 %v556_v30, %v554_v36 }
  0xe9   :  { %v177_v38 = vpop.xlane.xlu0 %176  ;;  %v995_v39 = vpop.eup %559  ;;  %v337_v51 = vmul.f32 1.442695, %v990_v21  ;;  %v339_v15 = vmul.f32 1.442695, %v993_v22  ;;  %v385_v63 = vmul.f32 %v987_v35, %v928_v10 }
  0xea   :  { %579 = vpow2.f32 %v217_v33  ;;  %v193_v45 = vsub.f32 %v893_v42, %v177_v38  ;;  %v194_v47 = vsub.f32 %v895_v46, %v177_v38  ;;  %v562_v49 = vpop.eup %561  ;;  %351 = vadd.xlane.f32.xlu1 %v350_v43  ;;  %v235_v50 = vadd.f32 %v995_v39, %v987_v35 }
  0xeb   :  { %581 = vpow2.f32 %v219_v23  ;;  %v564_v40 = vpop.eup %563  ;;  %v384_v38 = vmul.f32 %v981_v26, %v921_v0  ;;  %v386_v0 = vmul.f32 %v995_v39, %v931_v12 }
  0xec   :  { %583 = vpow2.f32 %v335_v34  ;;  %v221_v54 = vmul.f32 1.442695, %v193_v45  ;;  %v223_v41 = vmul.f32 1.442695, %v194_v47  ;;  %v566_v58 = vpop.eup %565  ;;  %236 = vadd.xlane.f32.xlu0 %v235_v50  ;;  %v353_v55 = vadd.f32 %v564_v40, %v562_v49 }
  0xed   :  { %585 = vpow2.f32 %v337_v51  ;;  %v180_v42 = vpop.xlane.xlu0 %179  ;;  %v568_v46 = vpop.eup %567  ;;  %v381_v45 = vmul.f32 %v957_v60, %v910_v16  ;;  %v382_v47 = vmul.f32 %v965_v4, %v913_v57  ;;  %v400_v49 = vadd.f32 %v384_v38, %v383_v25 }
  0xee   :  { %587 = vpow2.f32 %v221_v54  ;;  %v195_v59 = vsub.f32 %v903_v52, %v180_v42  ;;  %v196_v56 = vsub.f32 %v905_v53, %v180_v42  ;;  %v570_v62 = vpop.eup %569  ;;  %354 = vadd.xlane.f32.xlu1 %v353_v55  ;;  %v238_v7 = vadd.f32 %v568_v46, %v566_v58 }
  0xef   :  { %589 = vpow2.f32 %v223_v41  ;;  %v572_v8 = vpop.eup %571  ;;  %v232_v53 = vadd.f32 %v981_v26, %v973_v18  ;;  %v387_v50 = vmul.f32 %v566_v58, %v938_v24  ;;  %v388_v51 = vmul.f32 %v568_v46, %v941_v27 }
  0xf0   :  { %591 = vpow2.f32 %v339_v15  ;;  %v225_v5 = vmul.f32 1.442695, %v195_v59  ;;  %v227_v6 = vmul.f32 1.442695, %v196_v56  ;;  %v574_v9 = vpop.eup %573  ;;  %239 = vadd.xlane.f32.xlu0 %v238_v7  ;;  %v356_v14 = vadd.f32 %v572_v8, %v570_v62 }
  0xf1   :  { %v576_v2 = vpop.eup %575  ;;  %v397_v40 = vadd.f32 %v382_v47, %v381_v45  ;;  %v406_v18 = vadd.f32 %v388_v51, %v387_v50  ;;  %v403_v60 = vadd.f32 %v386_v0, %v385_v63  ;;  %v389_v24 = vmul.f32 %v574_v9, %v948_v44 }
  0xf2   :  { %593 = vpow2.f32 %v225_v5  ;;  %v578_v3 = vpop.eup %577  ;;  %357 = vadd.xlane.f32.xlu1 %v356_v14  ;;  %v241_v17 = vadd.f32 %v576_v2, %v574_v9  ;;  %v390_v27 = vmul.f32 %v576_v2, %v951_v48  ;;  %v728_v44 = vmov 0.0  }
  0xf3   :  { %595 = vpow2.f32 %v227_v6  ;;  %74 = vst.msk [vmem:[#allocation2 + $0x8] sm:$0xff] %vm72_vm0, %v728_v44  ;;  %73 = vst.msk [vmem:[#allocation2] sm:$0xff] %vm72_vm0, %v728_v44 }
  0xf4   :  { %v580_v52 = vpop.eup %579  ;;  %242 = vadd.xlane.f32.xlu0 %v241_v17  ;;  %v409_v12 = vadd.f32 %v390_v27, %v389_v24  ;;  %75 = vst.msk [vmem:[#allocation2 + $0x10] sm:$0xff] %vm72_vm0, %v728_v44  ;;  %76 = vst.msk [vmem:[#allocation2 + $0x18] sm:$0xff] %vm72_vm0, %v728_v44 }
  0xf5   :  { %v582_v31 = vpop.eup %581  ;;  %v391_v16 = vmul.f32 %v580_v52, %v960_v1  ;;  %77 = vst.msk [vmem:[#allocation2 + $0x20] sm:$0xff] %vm72_vm0, %v728_v44  ;;  %78 = vst.msk [vmem:[#allocation2 + $0x28] sm:$0xff] %vm72_vm0, %v728_v44 }
  0xf6   :  { %v584_v32 = vpop.eup %583  ;;  %v244_v11 = vadd.f32 %v582_v31, %v580_v52  ;;  %233 = vadd.xlane.f32.xlu1 %v232_v53  ;;  %v392_v57 = vmul.f32 %v582_v31, %v963_v61  ;;  %79 = vst.msk [vmem:[#allocation2 + $0x30] sm:$0xff] %vm72_vm0, %v728_v44  ;;  %80 = vst.msk [vmem:[#allocation2 + $0x38] sm:$0xff] %vm72_vm0, %v728_v44 }
  0xf7   :  { %v586_v13 = vpop.eup %585  ;;  %v359_v28 = vadd.f32 %v584_v32, %v578_v3 }
  0xf8   :  { %v588_v29 = vpop.eup %587  ;;  %245 = vadd.xlane.f32.xlu0 %v244_v11  ;;  %v412_v4 = vadd.f32 %v392_v57, %v391_v16 }
  0xf9   :  { %v590_v36 = vpop.eup %589  ;;  %v393_v35 = vmul.f32 %v588_v29, %v976_v19 }
  0xfa   :  { %v592_v37 = vpop.eup %591  ;;  %v247_v30 = vadd.f32 %v590_v36, %v588_v29  ;;  %360 = vadd.xlane.f32.xlu1 %v359_v28  ;;  %v394_v1 = vmul.f32 %v590_v36, %v979_v20  ;;  %v446_v52 = vld [vmem:[#allocation2 + $0x8] sm:$0xff]  ;;  %v445_v29 = vld [vmem:[#allocation2] sm:$0xff] }
  0xfb   :  { %v362_v33 = vadd.f32 %v592_v37, %v586_v13  ;;  %v448_v38 = vld [vmem:[#allocation2 + $0x18] sm:$0xff]  ;;  %v447_v63 = vld [vmem:[#allocation2 + $0x10] sm:$0xff] }
  0xfc   :  { %v594_v23 = vpop.eup %593  ;;  %248 = vadd.xlane.f32.xlu0 %v247_v30  ;;  %v415_v39 = vadd.f32 %v394_v1, %v393_v35  ;;  %v449_v44 = vld [vmem:[#allocation2 + $0x20] sm:$0xff] }
  0xfd   :  { %v596_v34 = vpop.eup %595  ;;  %v395_v26 = vmul.f32 %v594_v23, %v990_v21 }
  0xfe   :  { %v250_v43 = vadd.f32 %v596_v34, %v594_v23  ;;  %363 = vadd.xlane.f32.xlu1 %v362_v33  ;;  %v396_v10 = vmul.f32 %v596_v34, %v993_v22 }
 0x100   :  { %251 = vadd.xlane.f32.xlu0 %v250_v43  ;;  %v418_v61 = vadd.f32 %v396_v10, %v395_v26 }
 0x102   :  { %401 = vadd.xlane.f32.xlu1 %v400_v49 }
 0x104   :  { %398 = vadd.xlane.f32.xlu0 %v397_v40 }
 0x106   :  { %407 = vadd.xlane.f32.xlu1 %v406_v18 }
 0x108   :  { %404 = vadd.xlane.f32.xlu0 %v403_v60 }
 0x10a   :  { %413 = vadd.xlane.f32.xlu1 %v412_v4  ;;  %v450_v4 = vld [vmem:[#allocation2 + $0x28] sm:$0xff] }
 0x10c   :  { %410 = vadd.xlane.f32.xlu0 %v409_v12 }
 0x10e   :  { %419 = vadd.xlane.f32.xlu1 %v418_v61 }
 0x110   :  { %416 = vadd.xlane.f32.xlu0 %v415_v39 }
 0x169   :  { %v343_v48 = vpop.xlane.xlu0 %342 }
 0x16c   :  { %v346_v19 = vpop.xlane.xlu1 %345 }
 0x16d   :  { %597 = vlog2.f32 %v346_v19 }
 0x171   :  { %v231_v21 = vpop.xlane.xlu0 %230 }
 0x173   :  { %v349_v20 = vpop.xlane.xlu1 %348 }
 0x177   :  { %v352_v22 = vpop.xlane.xlu1 %351  ;;  %v598_v7 = vpop.eup %597 }
 0x178   :  { %v368_v2 = vmul.f32 0.6931472, %v598_v7 }
 0x179   :  { %v237_v54 = vpop.xlane.xlu0 %236 }
 0x17b   :  { %v355_v41 = vpop.xlane.xlu1 %354 }
 0x17d   :  { %v240_v15 = vpop.xlane.xlu0 %239 }
 0x17f   :  { %v358_v58 = vpop.xlane.xlu1 %357 }
 0x181   :  { %v243_v42 = vpop.xlane.xlu0 %242 }
 0x183   :  { %v234_v55 = vpop.xlane.xlu1 %233 }
 0x184   :  { %599 = vrcp.f32 %v234_v55 }
 0x185   :  { %601 = vlog2.f32 %v343_v48  ;;  %v246_v46 = vpop.xlane.xlu0 %245 }
 0x186   :  { %603 = vrcp.f32 %v231_v21 }
 0x187   :  { %605 = vlog2.f32 %v352_v22  ;;  %v361_v59 = vpop.xlane.xlu1 %360 }
 0x188   :  { %607 = vlog2.f32 %v349_v20 }
 0x189   :  { %609 = vrcp.f32 %v240_v15  ;;  %v249_v56 = vpop.xlane.xlu0 %248 }
 0x18a   :  { %611 = vrcp.f32 %v237_v54 }
 0x18b   :  { %613 = vlog2.f32 %v358_v58  ;;  %v364_v62 = vpop.xlane.xlu1 %363 }
 0x18c   :  { %615 = vlog2.f32 %v355_v41  ;;  %v452_v41 = vld [vmem:[#allocation2 + $0x38] sm:$0xff] }
 0x18d   :  { %617 = vrcp.f32 %v246_v46  ;;  %v252_v8 = vpop.xlane.xlu0 %251 }
 0x18e   :  { %v600_v5 = vpop.eup %599  ;;  %619 = vrcp.f32 %v243_v42 }
 0x18f   :  { %v602_v6 = vpop.eup %601  ;;  %621 = vlog2.f32 %v364_v62  ;;  %v402_v9 = vpop.xlane.xlu1 %401 }
 0x190   :  { %v604_v14 = vpop.eup %603  ;;  %623 = vlog2.f32 %v361_v59  ;;  %v424_v3 = vmul.f32 %v600_v5, %v402_v9  ;;  %v366_v32 = vmul.f32 0.6931472, %v602_v6 }
 0x191   :  { %v606_v17 = vpop.eup %605  ;;  %625 = vrcp.f32 %v252_v8  ;;  %v399_v31 = vpop.xlane.xlu0 %398 }
 0x192   :  { %v608_v53 = vpop.eup %607  ;;  %v438_v11 = vsub.f32 %v368_v2, %v424_v3  ;;  %v422_v13 = vmul.f32 %v604_v14, %v399_v31  ;;  %627 = vrcp.f32 %v249_v56  ;;  %v372_v30 = vmul.f32 0.6931472, %v606_v17  ;;  %v451_v56 = vld [vmem:[#allocation2 + $0x30] sm:$0xff] }
 0x193   :  { %v610_v28 = vpop.eup %609  ;;  %v408_v36 = vpop.xlane.xlu1 %407  ;;  %v370_v47 = vmul.f32 0.6931472, %v608_v53 }
 0x194   :  { %v612_v37 = vpop.eup %611  ;;  %v454_v33 = vadd.f32 %v446_v52, %v438_v11  ;;  %v437_v23 = vsub.f32 %v366_v32, %v422_v13  ;;  %v428_v34 = vmul.f32 %v610_v28, %v408_v36 }
 0x195   :  { %v614_v25 = vpop.eup %613  ;;  %v405_v43 = vpop.xlane.xlu0 %404 }
 0x196   :  { %v616_v45 = vpop.eup %615  ;;  %463 = vst.msk [vmem:[#allocation2 + $0x8] sm:$0xff] %vm72_vm0, %v454_v33  ;;  %v453_v49 = vadd.f32 %v445_v29, %v437_v23  ;;  %v440_v50 = vsub.f32 %v372_v30, %v428_v34  ;;  %v426_v51 = vmul.f32 %v612_v37, %v405_v43  ;;  %v376_v16 = vmul.f32 0.6931472, %v614_v25 }
 0x197   :  { %v618_v40 = vpop.eup %617  ;;  %v414_v0 = vpop.xlane.xlu1 %413  ;;  %v374_v12 = vmul.f32 0.6931472, %v616_v45 }
 0x198   :  { %v620_v18 = vpop.eup %619  ;;  %462 = vst.msk [vmem:[#allocation2] sm:$0xff] %vm72_vm0, %v453_v49  ;;  %v456_v57 = vadd.f32 %v448_v38, %v440_v50  ;;  %v439_v60 = vsub.f32 %v370_v47, %v426_v51  ;;  %v432_v24 = vmul.f32 %v618_v40, %v414_v0 }
 0x199   :  { %v622_v27 = vpop.eup %621  ;;  %v411_v26 = vpop.xlane.xlu0 %410 }
 0x19a   :  { %v624_v10 = vpop.eup %623  ;;  %465 = vst.msk [vmem:[#allocation2 + $0x18] sm:$0xff] %vm72_vm0, %v456_v57  ;;  %v455_v35 = vadd.f32 %v447_v63, %v439_v60  ;;  %v442_v1 = vsub.f32 %v376_v16, %v432_v24  ;;  %v430_v61 = vmul.f32 %v620_v18, %v411_v26  ;;  %v380_v19 = vmul.f32 0.6931472, %v622_v27 }
 0x19b   :  { %v626_v39 = vpop.eup %625  ;;  %v420_v48 = vpop.xlane.xlu1 %419  ;;  %v378_v42 = vmul.f32 0.6931472, %v624_v10 }
 0x19c   :  { %464 = vst.msk [vmem:[#allocation2 + $0x10] sm:$0xff] %vm72_vm0, %v455_v35  ;;  %v458_v20 = vadd.f32 %v450_v4, %v442_v1  ;;  %v441_v21 = vsub.f32 %v374_v12, %v430_v61  ;;  %v436_v22 = vmul.f32 %v626_v39, %v420_v48  ;;  %v628_v54 = vpop.eup %627 }
 0x19d   :  { %v417_v15 = vpop.xlane.xlu0 %416  ;;  %v474_v58 = vld [vmem:[#allocation2 + $0x8] sm:$0xff] }
 0x19e   :  { %467 = vst.msk [vmem:[#allocation2 + $0x28] sm:$0xff] %vm72_vm0, %v458_v20  ;;  %v457_v55 = vadd.f32 %v449_v44, %v441_v21  ;;  %v444_v46 = vsub.f32 %v380_v19, %v436_v22  ;;  %v434_v59 = vmul.f32 %v628_v54, %v417_v15  ;;  %v482_v6 = vsel %vm72_vm0, %v474_v58, 0.0 }
 0x19f   :  { %v473_v62 = vld [vmem:[#allocation2] sm:$0xff] }
 0x1a0   :  { %466 = vst.msk [vmem:[#allocation2 + $0x20] sm:$0xff] %vm72_vm0, %v457_v55  ;;  %v460_v7 = vadd.f32 %v452_v41, %v444_v46  ;;  %v443_v8 = vsub.f32 %v378_v42, %v434_v59  ;;  %v481_v5 = vsel %vm72_vm0, %v473_v62, 0.0 }
 0x1a1   :  { %v476_v2 = vld [vmem:[#allocation2 + $0x18] sm:$0xff]  ;;  %v483_v3 = vadd.f32 %v482_v6, %v481_v5 }
 0x1a2   :  { %469 = vst.msk [vmem:[#allocation2 + $0x38] sm:$0xff] %vm72_vm0, %v460_v7  ;;  %v459_v9 = vadd.f32 %v451_v56, %v443_v8  ;;  %v486_v31 = vsel %vm72_vm0, %v476_v2, 0.0 }
 0x1a3   :  { %v475_v14 = vld [vmem:[#allocation2 + $0x10] sm:$0xff] }
 0x1a4   :  { %468 = vst.msk [vmem:[#allocation2 + $0x30] sm:$0xff] %vm72_vm0, %v459_v9  ;;  %v484_v17 = vsel %vm72_vm0, %v475_v14, 0.0 }
 0x1a5   :  { %v485_v52 = vadd.f32 %v484_v17, %v483_v3  ;;  %v478_v32 = vld [vmem:[#allocation2 + $0x28] sm:$0xff] }
 0x1a6   :  { %v490_v29 = vsel %vm72_vm0, %v478_v32, 0.0 }
 0x1a7   :  { %v477_v53 = vld [vmem:[#allocation2 + $0x20] sm:$0xff]  ;;  %v487_v11 = vadd.f32 %v486_v31, %v485_v52 }
 0x1a8   :  { %v488_v13 = vsel %vm72_vm0, %v477_v53, 0.0 }
 0x1a9   :  { %v489_v28 = vadd.f32 %v488_v13, %v487_v11  ;;  %v480_v37 = vld [vmem:[#allocation2 + $0x38] sm:$0xff] }
 0x1aa   :  { %v494_v34 = vsel %vm72_vm0, %v480_v37, 0.0 }
 0x1ab   :  { %v479_v36 = vld [vmem:[#allocation2 + $0x30] sm:$0xff]  ;;  %v491_v30 = vadd.f32 %v490_v29, %v489_v28 }
 0x1ac   :  { %v492_v33 = vsel %vm72_vm0, %v479_v36, 0.0 }
 0x1ad   :  { %v493_v23 = vadd.f32 %v492_v33, %v491_v30 }
 0x1af   :  { %v495_v25 = vadd.f32 %v494_v34, %v493_v23 }
 0x1b1   :  { %496 = vadd.xlane.f32.xlu0 %v495_v25 }
 0x23e   :  { %v497_v38 = vpop.xlane.xlu0 %496 }
 0x23f   :  { %v498_v43 = vrot.slane %v497_v38, 4 }
 0x241   :  { %v499_v45 = vadd.f32 %v498_v43, %v497_v38 }
 0x243   :  { %v500_v47 = vrot.slane %v499_v45, 2 }
 0x245   :  { %v501_v49 = vadd.f32 %v500_v47, %v499_v45 }
 0x247   :  { %v502_v50 = vrot.slane %v501_v49, 1 }
 0x249   :  { %v503_v51 = vadd.f32 %v502_v50, %v501_v49 }
 0x24b   :  { %524 = vpush %v503_v51 }
 0x27c   :  { %s525_s22 = spop %524 }
 0x27d   :  { %v505_v40 = vstv %s525_s22 }
 0x27e   :  { %v506_v63 = vmul.f32 0.015625, %v505_v40 }
 0x280   :  { %507 = vst [vmem:[#allocation9] sm:$0xff] %v506_v63 }
 0x281   :  { %706 = shalt.err (!%p703_p0)
}
 0x282   :  { %s707_s26 = scalar_lea.hbm %s1068_s3, 128 }
 0x283   :  { %p708_p1 = scmp.ne.s32.totalorder %s1068_s3, %s707_s26  ;;  %p711_p2 = scmp.lt.u32.totalorder %s707_s26, %s1068_s3 }
 0x285   :  { %p713_p3 = pnand %p711_p2, %p708_p1 }
 0x287   :  { %716 = shalt.err (!%p713_p3)
}
 0x288   :  { %517 = dma.vmem_to_hbm [thread:$0]  %s515_s21, 128, %s1068_s3, [#allocation5]  }
 0x289   :  { %721 = dma.done.wait [#allocation5], 128  }
 0x28a   :  { %722 = vsyncadd [#allocation5], 4294967168 }
 0x28b   :  { %521 = vsyncpa [#allocation4], 1 }
 0x28c   :  { %522 = vsyncpa [#allocation7], 1 }
 0x28d   :  { %523 = vsyncpa [#allocation5], 1 }

</bundles_post_ra>
